<compile_context>
chip_gen: v7x
topology: tpu7x:2x2x1
jax: 0.10.0
libtpu: 0.0.40
codegen_flags: <defaults>
</compile_context>

<pallas_src>
import numpy as np
import jax
import jax.numpy as jnp
from jax.experimental import pallas as pl
from jax.experimental.pallas import tpu as pltpu

# ----------------------------- model config (small, synthetic) ----------------
VOXEL_SIZE = (0.4, 0.4, 4.0)
LIDAR_RANGE = (-3.2, -3.2, -3.0, 3.2, 3.2, 1.0)
OUT_SIZE_FACTOR = 1
GRID_NX = 16          # x direction (W)
GRID_NY = 16          # y direction (H)
MAX_CAV = 2
NUM_ANCHORS = 1       # anchor_number


def _bf16(x):
    return x.astype(jnp.bfloat16)


# ----------------------------- fused matmul + BN + act -------------------------
def _make_matmul_kernel(relu):
    def kernel(a_ref, w_ref, s_ref, b_ref, o_ref):
        acc = jnp.dot(_bf16(a_ref[...]), _bf16(w_ref[...]),
                      preferred_element_type=jnp.float32)
        acc = acc * s_ref[...] + b_ref[...]
        if relu:
            acc = jnp.maximum(acc, 0.0)
        o_ref[...] = acc
    return kernel


def matmul_bn_act(a, w, scale, bias, relu=True, row_blocks=1):
    """(M,K)@(K,N) * scale + bias (+ReLU), gridded over M row-blocks."""
    m, k = a.shape
    n = w.shape[1]
    assert m % row_blocks == 0
    bm = m // row_blocks
    assert bm % 8 == 0 or bm == m
    return pl.pallas_call(
        _make_matmul_kernel(relu),
        grid_spec=pltpu.PrefetchScalarGridSpec(
            num_scalar_prefetch=0,
            grid=(row_blocks,),
            in_specs=[pl.BlockSpec((bm, k), lambda i: (i, 0)),
                      pl.BlockSpec((k, n), lambda i: (0, 0)),
                      pl.BlockSpec((1, n), lambda i: (0, 0)),
                      pl.BlockSpec((1, n), lambda i: (0, 0))],
            out_specs=pl.BlockSpec((bm, n), lambda i: (i, 0))),
        out_shape=jax.ShapeDtypeStruct((m, n), jnp.float32),
        compiler_params=pltpu.CompilerParams(dimension_semantics=("parallel",)),
    )(a, w, scale.reshape(1, n), bias.reshape(1, n))


# ----------------------------- 3x3 conv with in-kernel 9-tap accumulation ------
def _make_conv3x3_kernel(taps, ho, wo, relu, res_mode):
    """taps: static tuple of (tap_idx, phase_idx, oy, ox)."""
    def kernel(*refs):
        if res_mode == 'none':
            xph_ref, w_ref, s_ref, b_ref, o_ref = refs
        elif res_mode == 'direct':
            xph_ref, w_ref, s_ref, b_ref, r_ref, o_ref = refs
        else:  # 'proj': fused 1x1 downsample projection on the identity path
            xph_ref, w_ref, s_ref, b_ref, ra_ref, rw_ref, rs_ref, rb_ref, o_ref = refs
        cin = xph_ref.shape[-1]
        acc = jnp.zeros(o_ref.shape, jnp.float32)
        for (t, ph, oy, ox) in taps:
            xt = xph_ref[ph, 0, oy:oy + ho, ox:ox + wo, :].reshape(ho * wo, cin)
            acc = acc + jnp.dot(_bf16(xt), _bf16(w_ref[t]),
                                preferred_element_type=jnp.float32)
        acc = acc * s_ref[...] + b_ref[...]
        if res_mode == 'direct':
            acc = acc + r_ref[...]
        elif res_mode == 'proj':
            ident = jnp.dot(_bf16(ra_ref[...]), _bf16(rw_ref[...]),
                            preferred_element_type=jnp.float32)
            acc = acc + (ident * rs_ref[...] + rb_ref[...])
        if relu:
            acc = jnp.maximum(acc, 0.0)
        o_ref[...] = acc
    return kernel


def conv3x3_bn(x, w, scale, bias, stride=1, relu=True, residual=None, res_proj=None):
    """3x3 conv (padding=1) + BN (+ residual / projected residual) (+ ReLU).

    x: (N,H,W,Cin) NHWC; w: (Cout,Cin,3,3) PyTorch layout.
    The padded input is decomposed into stride*stride phase tensors in XLA
    (~1x data, not the 9x of im2col); the 9 taps are accumulated inside one
    Pallas kernel, gridded over the CAV/batch axis ('parallel')."""
    n, h, wd, cin = x.shape
    cout = w.shape[0]
    st = stride
    ho = (h - 1) // st + 1
    wo = (wd - 1) // st + 1
    xp = jnp.pad(x, ((0, 0), (1, 1), (1, 1), (0, 0)))
    if st == 1:
        xph = xp[None]                                   # (1, N, H+2, W+2, Cin)
    else:
        phases = [xp[:, py::st, px::st, :] for py in range(st) for px in range(st)]
        for ph_ in phases:
            assert ph_.shape[1:3] == phases[0].shape[1:3]
        xph = jnp.stack(phases, axis=0)                  # (st*st, N, Hph, Wph, Cin)
    nphase, _, hph, wph, _ = xph.shape
    wt = jnp.transpose(w, (2, 3, 1, 0)).reshape(9, cin, cout)
    taps = tuple((dy * 3 + dx, (dy % st) * st + (dx % st), dy // st, dx // st)
                 for dy in range(3) for dx in range(3))

    m = n * ho * wo
    in_specs = [pl.BlockSpec((nphase, 1, hph, wph, cin), lambda i: (0, i, 0, 0, 0)),
                pl.BlockSpec((9, cin, cout), lambda i: (0, 0, 0)),
                pl.BlockSpec((1, cout), lambda i: (0, 0)),
                pl.BlockSpec((1, cout), lambda i: (0, 0))]
    args = [xph, wt, scale.reshape(1, cout), bias.reshape(1, cout)]
    res_mode = 'none'
    if residual is not None:
        res_mode = 'direct'
        in_specs.append(pl.BlockSpec((ho * wo, cout), lambda i: (i, 0)))
        args.append(residual.reshape(m, cout))
    elif res_proj is not None:
        res_mode = 'proj'
        ra, rw, rs, rb = res_proj                        # ra: (N,Ho,Wo,Cr), rw: (Cr,Cout)
        cr = rw.shape[0]
        in_specs += [pl.BlockSpec((ho * wo, cr), lambda i: (i, 0)),
                     pl.BlockSpec((cr, cout), lambda i: (0, 0)),
                     pl.BlockSpec((1, cout), lambda i: (0, 0)),
                     pl.BlockSpec((1, cout), lambda i: (0, 0))]
        args += [ra.reshape(m, cr), rw, rs.reshape(1, cout), rb.reshape(1, cout)]

    out = pl.pallas_call(
        _make_conv3x3_kernel(taps, ho, wo, relu, res_mode),
        grid_spec=pltpu.PrefetchScalarGridSpec(
            num_scalar_prefetch=0,
            grid=(n,),
            in_specs=in_specs,
            out_specs=pl.BlockSpec((ho * wo, cout), lambda i: (i, 0))),
        out_shape=jax.ShapeDtypeStruct((m, cout), jnp.float32),
        compiler_params=pltpu.CompilerParams(dimension_semantics=("parallel",)),
    )(*args)
    return out.reshape(n, ho, wo, cout)


# ----------------------------- PillarVFE PFN layer -----------------------------
def _pfn_kernel(x_ref, w_ref, s_ref, b_ref, o_ref):
    # x_ref: (P*Npts, 10), pillar-major rows.  ONE dot -> BN -> ReLU -> sublane
    # max over the point axis.  Padded point rows contribute ReLU(BN(0)), which
    # matches the PyTorch PillarVFE (mask is applied to features, not the max).
    p, c = o_ref.shape
    npts = x_ref.shape[0] // p
    y = jnp.dot(_bf16(x_ref[...]), _bf16(w_ref[...]),
                preferred_element_type=jnp.float32)
    y = jnp.maximum(y * s_ref[...] + b_ref[...], 0.0)
    o_ref[...] = jnp.max(y.reshape(p, npts, c), axis=1)


def pfn_forward(feats_pnd, w, scale, bias):
    # feats_pnd: (P, Npts, 10)  ->  (P, C)
    p, npts, din = feats_pnd.shape
    c = w.shape[1]
    x = feats_pnd.reshape(p * npts, din)
    return pl.pallas_call(
        _pfn_kernel,
        out_shape=jax.ShapeDtypeStruct((p, c), jnp.float32),
    )(x, w, scale.reshape(1, c), bias.reshape(1, c))


# ----------------------------- MaxFusion ---------------------------------------
def _max_fuse_kernel(cum_ref, len_ref, x_ref, o_ref):
    b = pl.program_id(0)
    k = pl.program_id(1)

    @pl.when(k == 0)
    def _():
        o_ref[...] = x_ref[...]

    # Padded steps (k >= record_len[b]) skip the read-modify-write entirely.
    @pl.when(jnp.logical_and(k > 0, k < len_ref[b]))
    def _():
        o_ref[...] = jnp.maximum(o_ref[...], x_ref[...])


def max_fusion(x, record_len, max_cav):
    """MaxFusion over the CAVs of each sample.  x: (L,H,W,C) -> (B,H,W,C).

    Operand is reshaped to lane-dense (L, HWC/128, 128) blocks; batch axis is
    'parallel' (megacore), CAV axis 'arbitrary'.  Assumes record_len[b] >= 1."""
    l, h, w, c = x.shape
    bsz = record_len.shape[0]
    rl = record_len.astype(jnp.int32)
    cum = jnp.concatenate(
        [jnp.zeros((1,), jnp.int32), jnp.cumsum(rl)[:-1].astype(jnp.int32)])

    lanes = 128
    flat = h * w * c
    assert flat % lanes == 0
    rows = flat // lanes
    xr = x.reshape(l, rows, lanes)

    def in_map(bi, k, cum_r, len_r):
        # Clamped re-read of the last valid CAV for padded steps (max-neutral).
        return (cum_r[bi] + jnp.minimum(k, len_r[bi] - 1), 0, 0)

    def out_map(bi, k, cum_r, len_r):
        return (bi, 0, 0)

    grid_spec = pltpu.PrefetchScalarGridSpec(
        num_scalar_prefetch=2,
        grid=(bsz, max_cav),
        in_specs=[pl.BlockSpec((1, rows, lanes), in_map)],
        out_specs=pl.BlockSpec((1, rows, lanes), out_map),
    )
    out = pl.pallas_call(
        _max_fuse_kernel,
        grid_spec=grid_spec,
        out_shape=jax.ShapeDtypeStruct((bsz, rows, lanes), jnp.float32),
        compiler_params=pltpu.CompilerParams(
            dimension_semantics=("parallel", "arbitrary")),
    )(cum, rl, xr)
    return out.reshape(bsz, h, w, c)


# ----------------------------- fused cls + reg heads ---------------------------
def _head_kernel(a0_ref, a1_ref, w0_ref, w1_ref, b_ref, o_ref):
    acc = jnp.dot(_bf16(a0_ref[...]), _bf16(w0_ref[...]),
                  preferred_element_type=jnp.float32)
    acc = acc + jnp.dot(_bf16(a1_ref[...]), _bf16(w1_ref[...]),
                        preferred_element_type=jnp.float32)
    o_ref[...] = acc + b_ref[...]


def fused_heads(up0, up1, cls_w, cls_b, reg_w, reg_b):
    """cls (N=A) and reg (N=8A) 1x1-conv heads fused into a single matmul with
    the weight columns concatenated and zero-padded to a lane-dense width of
    128; the channel concat of up0/up1 is folded in as a sum of two dots."""
    b, h, w, c = up0.shape
    n_cls = cls_w.shape[0]
    n_reg = reg_w.shape[0]
    nhead = n_cls + n_reg
    npad = max(128, ((nhead + 127) // 128) * 128)
    wcat = jnp.concatenate([cls_w[:, :, 0, 0], reg_w[:, :, 0, 0]], axis=0).T  # (2c, nhead)
    wcat = jnp.pad(wcat, ((0, 0), (0, npad - nhead)))
    bcat = jnp.pad(jnp.concatenate([cls_b, reg_b]), (0, npad - nhead)).reshape(1, npad)
    w0, w1 = wcat[:c], wcat[c:]

    m = b * h * w
    bm = h * w
    out = pl.pallas_call(
        _head_kernel,
        grid_spec=pltpu.PrefetchScalarGridSpec(
            num_scalar_prefetch=0,
            grid=(b,),
            in_specs=[pl.BlockSpec((bm, c), lambda i: (i, 0)),
                      pl.BlockSpec((bm, c), lambda i: (i, 0)),
                      pl.BlockSpec((c, npad), lambda i: (0, 0)),
                      pl.BlockSpec((c, npad), lambda i: (0, 0)),
                      pl.BlockSpec((1, npad), lambda i: (0, 0))],
            out_specs=pl.BlockSpec((bm, npad), lambda i: (i, 0))),
        out_shape=jax.ShapeDtypeStruct((m, npad), jnp.float32),
        compiler_params=pltpu.CompilerParams(dimension_semantics=("parallel",)),
    )(up0.reshape(m, c), up1.reshape(m, c), w0, w1, bcat)
    out = out.reshape(b, h * w, npad)
    cls = out[..., :n_cls]                   # (B, HW, A)
    bbox = out[..., n_cls:nhead]             # (B, HW, 8A)
    return cls, bbox


# ----------------------------- deblocks ----------------------------------------
def deconv2x2_bn_relu(x, w, scale, bias):
    # ConvTranspose2d(kernel=2, stride=2, bias=False); w: (Cin, Cout, 2, 2)
    n, h, wd, cin = x.shape
    cout = w.shape[1]
    wmat = w.reshape(cin, cout * 4)
    y = matmul_bn_act(x.reshape(n * h * wd, cin), wmat,
                      jnp.repeat(scale, 4), jnp.repeat(bias, 4),
                      relu=True, row_blocks=n)
    y = y.reshape(n, h, wd, cout, 2, 2)
    y = jnp.transpose(y, (0, 1, 4, 2, 5, 3)).reshape(n, 2 * h, 2 * wd, cout)
    return y


def deblock(x, w, scale, bias, stride):
    if stride == 1:   # ConvTranspose2d(k=1, s=1) == 1x1 conv; w: (Cin,Cout,1,1)
        n, h, wd, cin = x.shape
        cout = w.shape[1]
        y = matmul_bn_act(x.reshape(n * h * wd, cin), w[:, :, 0, 0],
                          scale, bias, relu=True, row_blocks=n)
        return y.reshape(n, h, wd, cout)
    return deconv2x2_bn_relu(x, w, scale, bias)


# ----------------------------- ResNet basic block -------------------------------
def basic_block(x, p, prefix, stride, downsample):
    out = conv3x3_bn(x, p[f'{prefix}_conv1_w'], *p[f'{prefix}_bn1'],
                     stride=stride, relu=True)
    if downsample:
        # Fuse the 1x1 strided downsample + BN of the identity path into conv2.
        ra = x[:, ::stride, ::stride, :]
        rw = jnp.transpose(p[f'{prefix}_down_w'][:, :, 0, 0])     # (Cin, Cout)
        rs, rb = p[f'{prefix}_down_bn']
        out = conv3x3_bn(out, p[f'{prefix}_conv2_w'], *p[f'{prefix}_bn2'],
                         stride=1, relu=True, res_proj=(ra, rw, rs, rb))
    else:
        out = conv3x3_bn(out, p[f'{prefix}_conv2_w'], *p[f'{prefix}_bn2'],
                         stride=1, relu=True, residual=x)
    return out


# ----------------------------- box decode (plain JAX, per perf review) ----------
def decode_boxes(bbox_flat, H, W):
    # bbox_flat: (B, H*W, 8); matches the module's generate_predicted_boxes.
    vx, vy, vz = VOXEL_SIZE
    osf = OUT_SIZE_FACTOR
    idx = jnp.arange(H * W)
    xs_i = (idx % W).astype(jnp.float32)[None, :, None]
    ys_i = (idx // W).astype(jnp.float32)[None, :, None]
    xs = (xs_i + bbox_flat[..., 0:1]) * (osf * vx) + LIDAR_RANGE[0]
    ys = (ys_i + bbox_flat[..., 1:2]) * (osf * vy) + LIDAR_RANGE[1]
    hei = bbox_flat[..., 2:3] * (osf * vz) + LIDAR_RANGE[2]
    dh = bbox_flat[..., 3:4] * (osf * vx)
    dw = bbox_flat[..., 4:5] * (osf * vy)
    dl = bbox_flat[..., 5:6] * (osf * vz)
    rot = jnp.arctan2(bbox_flat[..., 6:7], bbox_flat[..., 7:8])
    return jnp.concatenate([xs, ys, hei, dh, dw, dl, rot], axis=-1)


# ----------------------------- parameters -------------------------------------
def init_params(key):
    ks = jax.random.split(key, 10)

    def conv_w(k, cout, cin, kh, kw, std=0.05):
        return jax.random.normal(k, (cout, cin, kh, kw), jnp.float32) * std

    def bn_fold(c, eps=1e-5):
        gamma = jnp.ones((c,), jnp.float32)
        beta = jnp.zeros((c,), jnp.float32)
        mean = jnp.zeros((c,), jnp.float32)
        var = jnp.ones((c,), jnp.float32)
        scale = gamma / jnp.sqrt(var + eps)
        return scale, beta - mean * scale

    p = {}
    # PillarVFE: Linear(10, 64, bias=False) + BN1d(64, eps=1e-3)
    p['pfn_w'] = jax.random.normal(ks[0], (10, 64), jnp.float32) * 0.1
    p['pfn_bn'] = bn_fold(64, eps=1e-3)
    # ResNetBEVBackbone: layer_nums=[1,1], strides=[1,2], filters=[64,128]
    p['l0_conv1_w'] = conv_w(ks[1], 64, 64, 3, 3);   p['l0_bn1'] = bn_fold(64)
    p['l0_conv2_w'] = conv_w(ks[2], 64, 64, 3, 3);   p['l0_bn2'] = bn_fold(64)
    p['l1_conv1_w'] = conv_w(ks[3], 128, 64, 3, 3);  p['l1_bn1'] = bn_fold(128)
    p['l1_conv2_w'] = conv_w(ks[4], 128, 128, 3, 3); p['l1_bn2'] = bn_fold(128)
    p['l1_down_w'] = conv_w(ks[5], 128, 64, 1, 1);   p['l1_down_bn'] = bn_fold(128)
    # deblocks (upsample_strides=[1,2], num_upsample_filter=[64,64])
    p['de0_w'] = jax.random.normal(ks[6], (64, 64, 1, 1), jnp.float32) * 0.05
    p['de0_bn'] = bn_fold(64)
    p['de1_w'] = jax.random.normal(ks[7], (128, 64, 2, 2), jnp.float32) * 0.05
    p['de1_bn'] = bn_fold(64)
    # heads (out_channel = 64 + 64 = 128), init_weight() semantics
    p['cls_w'] = jax.random.normal(ks[8], (NUM_ANCHORS, 128, 1, 1), jnp.float32) * 0.05
    p['cls_b'] = jnp.full((NUM_ANCHORS,), -float(np.log((1 - 0.01) / 0.01)), jnp.float32)
    p['reg_w'] = jax.random.normal(ks[9], (8 * NUM_ANCHORS, 128, 1, 1), jnp.float32) * 0.001
    p['reg_b'] = jnp.zeros((8 * NUM_ANCHORS,), jnp.float32)
    return p


# ----------------------------- full forward ------------------------------------
def centerpoint_forward(params, voxel_features, voxel_coords, voxel_num_points,
                        record_len_np, pairwise_t_matrix):
    vx, vy, vz = VOXEL_SIZE
    x_off = vx / 2 + LIDAR_RANGE[0]
    y_off = vy / 2 + LIDAR_RANGE[1]
    z_off = vz / 2 + LIDAR_RANGE[2]
    P, Npts, _ = voxel_features.shape
    n_cav = int(np.sum(record_len_np))

    # ---- PillarVFE feature augmentation (glue) ----
    pts_mean = (voxel_features[:, :, :3].sum(axis=1, keepdims=True)
                / voxel_num_points.astype(jnp.float32)[:, None, None])
    f_cluster = voxel_features[:, :, :3] - pts_mean
    cf = voxel_coords.astype(jnp.float32)
    f_center = jnp.stack([
        voxel_features[:, :, 0] - (cf[:, 3][:, None] * vx + x_off),
        voxel_features[:, :, 1] - (cf[:, 2][:, None] * vy + y_off),
        voxel_features[:, :, 2] - (cf[:, 1][:, None] * vz + z_off),
    ], axis=-1)
    feats = jnp.concatenate([voxel_features, f_cluster, f_center], axis=-1)   # (P, Npts, 10)
    mask = (jnp.arange(Npts)[None, :] < voxel_num_points[:, None]).astype(jnp.float32)
    feats = feats * mask[:, :, None]

    # ---- PFN layer (Pallas, single fused dot) ----
    pillar_features = pfn_forward(feats, params['pfn_w'], *params['pfn_bn'])  # (P, 64)

    # ---- PointPillarScatter ----
    # TODO(synk): data-dependent scatter kept in plain JAX (no clean Pallas equivalent).
    canvas = jnp.zeros((n_cav, GRID_NY * GRID_NX, 64), jnp.float32)
    flat_idx = voxel_coords[:, 2] * GRID_NX + voxel_coords[:, 3]
    canvas = canvas.at[voxel_coords[:, 0], flat_idx].set(pillar_features)
    spatial_features = canvas.reshape(n_cav, GRID_NY, GRID_NX, 64)            # NHWC

    # ---- normalize_pairwise_tfm (glue; identity transforms in this setup) ----
    t = pairwise_t_matrix
    aff = t[:, :, :, 0:2, :][:, :, :, :, jnp.array([0, 1, 3])]
    aff = aff.at[..., 0, 1].multiply(GRID_NY / GRID_NX)
    aff = aff.at[..., 1, 0].multiply(GRID_NX / GRID_NY)
    aff = aff.at[..., 0, 2].set(aff[..., 0, 2] / (VOXEL_SIZE[0] * GRID_NX) * 2)
    aff = aff.at[..., 1, 2].set(aff[..., 1, 2] / (VOXEL_SIZE[0] * GRID_NY) * 2)
    _ = aff
    # TODO(synk): warp_affine_simple (grid_sample) is skipped — identity transforms assumed.

    # ---- ResNetBEVBackbone.get_multiscale_feature (Pallas 9-tap conv kernels) ----
    x0 = basic_block(spatial_features, params, 'l0', stride=1, downsample=False)  # (L,16,16,64)
    x1 = basic_block(x0, params, 'l1', stride=2, downsample=True)                 # (L, 8, 8,128)
    feature_list = [x0, x1]

    # ---- MaxFusion per scale (Pallas, lane-dense, padded steps skipped) ----
    rl = jnp.asarray(record_len_np, jnp.int32)
    fused_list = [max_fusion(f, rl, MAX_CAV) for f in feature_list]

    # ---- decode_multiscale_feature: deblocks ----
    up0 = deblock(fused_list[0], params['de0_w'], *params['de0_bn'], stride=1)     # (B,16,16,64)
    up1 = deblock(fused_list[1], params['de1_w'], *params['de1_bn'], stride=2)     # (B,16,16,64)

    # ---- heads: ONE fused lane-dense matmul for cls + reg (channel concat folded) ----
    B, H, Wd, _ = up0.shape
    cls_flat, bbox_flat = fused_heads(up0, up1,
                                      params['cls_w'], params['cls_b'],
                                      params['reg_w'], params['reg_b'])
    cls = cls_flat.reshape(B, H, Wd, NUM_ANCHORS)
    bbox = bbox_flat.reshape(B, H, Wd, 8 * NUM_ANCHORS)

    # ---- generate_predicted_boxes (plain JAX; 7-wide output, launch overhead > compute) ----
    reg_preds = decode_boxes(bbox_flat.reshape(B, H * Wd, 8), H, Wd)

    return {
        'cls_preds': jnp.transpose(cls, (0, 3, 1, 2)),    # NCHW, matches PyTorch
        'reg_preds': reg_preds,                           # (B, H*W, 7)
        'bbox_preds': jnp.transpose(bbox, (0, 3, 1, 2)),  # NCHW, matches PyTorch
    }


# ----------------------------- main --------------------------------------------
if __name__ == "__main__":
    key = jax.random.PRNGKey(0)
    kp, kf = jax.random.split(key, 2)
    params = init_params(kp)

    # synthetic voxelized point-cloud input
    record_len = np.array([2, 1], dtype=np.int32)     # B=2 samples, 3 CAVs total
    n_cav = int(record_len.sum())
    pillars_per_cav = 10
    P, Npts = n_cav * pillars_per_cav, 8

    rng = np.random.default_rng(0)
    coords_list = []
    for b in range(n_cav):
        flat = rng.choice(GRID_NY * GRID_NX, size=pillars_per_cav, replace=False)
        ys, xs = flat // GRID_NX, flat % GRID_NX
        coords_list.append(np.stack([np.full_like(ys, b), np.zeros_like(ys), ys, xs], axis=1))
    voxel_coords = np.concatenate(coords_list, axis=0).astype(np.int32)       # (P, 4) b,z,y,x

    voxel_num_points = rng.integers(1, Npts + 1, size=P).astype(np.int32)
    vf = jax.random.normal(kf, (P, Npts, 4), jnp.float32) * 0.5
    pad_mask = (np.arange(Npts)[None, :] < voxel_num_points[:, None]).astype(np.float32)
    voxel_features = vf * jnp.asarray(pad_mask)[:, :, None]

    pairwise_t_matrix = jnp.tile(jnp.eye(4, dtype=jnp.float32),
                                 (len(record_len), MAX_CAV, MAX_CAV, 1, 1))

    out = centerpoint_forward(params, voxel_features,
                              jnp.asarray(voxel_coords, jnp.int32),
                              jnp.asarray(voxel_num_points, jnp.int32),
                              record_len, pairwise_t_matrix)
    jax.block_until_ready(out)

    assert out['cls_preds'].shape == (2, NUM_ANCHORS, GRID_NY, GRID_NX)
    assert out['bbox_preds'].shape == (2, 8 * NUM_ANCHORS, GRID_NY, GRID_NX)
    assert out['reg_preds'].shape == (2, GRID_NY * GRID_NX, 7)
    print("KERNEL_OK")
</pallas_src>

<mosaic_0001>
module attributes {stable_mosaic.version = 11 : i64} {
  func.func @_pfn_kernel(%arg0: memref<240x10xf32, #tpu.memory_space<vmem>>, %arg1: memref<10x64xf32, #tpu.memory_space<vmem>>, %arg2: memref<1x64xf32, #tpu.memory_space<vmem>>, %arg3: memref<1x64xf32, #tpu.memory_space<vmem>>, %arg4: memref<30x64xf32, #tpu.memory_space<vmem>>) attributes {dimension_semantics = [], scalar_prefetch = 0 : i64, scratch_operands = 0 : i64, tpu.core_type = #tpu.core_type<tc>} {
    %c0 = arith.constant 0 : index
    %c0_0 = arith.constant 0 : index
    %0 = vector.load %arg0[%c0, %c0_0] : memref<240x10xf32, #tpu.memory_space<vmem>>, vector<240x10xf32>
    %1 = arith.truncf %0 : vector<240x10xf32> to vector<240x10xbf16>
    %c0_1 = arith.constant 0 : index
    %c0_2 = arith.constant 0 : index
    %2 = vector.load %arg1[%c0_1, %c0_2] : memref<10x64xf32, #tpu.memory_space<vmem>>, vector<10x64xf32>
    %3 = arith.truncf %2 : vector<10x64xf32> to vector<10x64xbf16>
    %cst = arith.constant dense<0.000000e+00> : vector<240x64xf32>
    %4 = tpu.matmul %1, %3, %cst {dimension_numbers = #tpu.dot_dimension_numbers<[1], [0], [0], [1], [0, 0, 1, 1], [], []>} : vector<240x10xbf16>, vector<10x64xbf16>, vector<240x64xf32> -> vector<240x64xf32>
    %c0_3 = arith.constant 0 : index
    %c0_4 = arith.constant 0 : index
    %5 = vector.load %arg2[%c0_3, %c0_4] : memref<1x64xf32, #tpu.memory_space<vmem>>, vector<1x64xf32>
    %6 = vector.broadcast %5 : vector<1x64xf32> to vector<240x64xf32>
    %7 = arith.mulf %4, %6 : vector<240x64xf32>
    %c0_5 = arith.constant 0 : index
    %c0_6 = arith.constant 0 : index
    %8 = vector.load %arg3[%c0_5, %c0_6] : memref<1x64xf32, #tpu.memory_space<vmem>>, vector<1x64xf32>
    %9 = vector.broadcast %8 : vector<1x64xf32> to vector<240x64xf32>
    %10 = arith.addf %7, %9 : vector<240x64xf32>
    %cst_7 = arith.constant 0.000000e+00 : f32
    %11 = vector.broadcast %cst_7 : f32 to vector<240x64xf32>
    %12 = arith.maximumf %10, %11 : vector<240x64xf32>
    %13 = vector.shape_cast %12 : vector<240x64xf32> to vector<30x8x64xf32>
    %cst_8 = arith.constant dense<0xFF800000> : vector<30x64xf32>
    %14 = vector.multi_reduction <maximumf>, %13, %cst_8 [1] : vector<30x8x64xf32> to vector<30x64xf32>
    %c0_9 = arith.constant 0 : index
    %c0_10 = arith.constant 0 : index
    %15 = vector.load %arg4[%c0_9, %c0_10] : memref<30x64xf32, #tpu.memory_space<vmem>>, vector<30x64xf32>
    tpu.vector_store %arg4[%c0_9, %c0_10], %14 {strides = array<i32>} : memref<30x64xf32, #tpu.memory_space<vmem>>, vector<30x64xf32>,
    return
  }
}

</mosaic_0001>

<bundles_post_ra>
// kernel: tpu_custom_call.1
= control target key start
LH: loop header
LB: loop body
LE: loop exit
PB: predicated region body
PF: predicated region fallthrough
CT: control target
= control target key end

     0   :  { %vm113_vm0 = vcmask 1044480   ;;  %v799_v2 = vmov 0.0   ;;  %vm800_vm1 = vmmov 0   ;;  %vm67_vm2 = vcmask 80896   ;;  %s1143_s0 = inlined_call_operand.vmem [shape: f32[240,10], index: 0, kind: input, shape index: {}]   ;;  %s1144_s1 = inlined_call_operand.vmem [shape: f32[10,64], index: 1, kind: input, shape index: {}]   ;;  %s1145_s2 = inlined_call_operand.vmem [shape: f32[1,64], index: 2, kind: input, shape index: {}]   ;;  %s1146_s3 = inlined_call_operand.vmem [shape: f32[1,64], index: 3, kind: input, shape index: {}]   ;;  %s1147_s4 = inlined_call_operand.hbm [shape: f32[30,64], index: 4, kind: output, shape index: {}]  }
   0x1   :  { %v64_v0 = vld [vmem:[%s1144_s1] sm:$0xff]  ;;  %v65_v1 = vld [vmem:[%s1144_s1 + $0x8] sm:$0x3]  ;;  %706 = vmatprep.subr.bf16.mxu0 %v799_v2  ;;  %768 = vmatprep.subr.bf16.mxu1 %v799_v2  ;;  %v21_v11 = vld [vmem:[%s1143_s0 + $0x10] sm:$0xff] }
   0x2   :  { %v66_v3 = vpack.c.bf16 %v65_v1, %v64_v0  ;;  %v19_v4 = vld [vmem:[%s1143_s0] sm:$0xff]  ;;  %v20_v5 = vld [vmem:[%s1143_s0 + $0x8] sm:$0xff]  ;;  %708 = vmatprep.mubr.msk.bf16.mxu0 %vm800_vm1, %v799_v2  ;;  %740 = vmatprep.mubr.msk.bf16.mxu1 %vm800_vm1, %v799_v2  ;;  %v22_v12 = vld [vmem:[%s1143_s0 + $0x18] sm:$0xff] }
   0x3   :  { %v35_v6 = vld [vmem:[%s1143_s0 + $0x80] sm:$0xff]  ;;  %v36_v7 = vld [vmem:[%s1143_s0 + $0x88] sm:$0xff]  ;;  %v49_v9 = vpack.c.bf16 %v20_v5, %v19_v4  ;;  %v37_v13 = vld [vmem:[%s1143_s0 + $0x90] sm:$0xff]  ;;  %v50_v15 = vpack.c.bf16 %v22_v12, %v21_v11 }
   0x4   :  { %v115_v8 = vsel %vm113_vm0, %v66_v3, 0  ;;  %v57_v10 = vpack.c.bf16 %v36_v7, %v35_v6  ;;  %v38_v14 = vld [vmem:[%s1143_s0 + $0x98] sm:$0xff] }
   0x5   :  { %707 = vmatpush3.bf16.msra.mxu0 %v115_v8  ;;  %769 = vmatpush3.bf16.msra.mxu1 %v115_v8  ;;  %v58_v16 = vpack.c.bf16 %v38_v14, %v37_v13 }
   0x8   :  { %709 = vmatmul.mubr.msk.bf16.vlgmr.msra.gmra.mrb[0].mxu0 %vm67_vm2, %v49_v9  ;;  %741 = vmatmul.mubr.msk.bf16.vlgmr.msra.gmra.mrb[0].mxu1 %vm67_vm2, %v57_v10 }
   0x9   :  { %712 = vmatprep.mubr.msk.bf16.mxu0 %vm800_vm1, %v799_v2  ;;  %744 = vmatprep.mubr.msk.bf16.mxu1 %vm800_vm1, %v799_v2 }
   0xa   :  { %9 = vsyncpa [#allocation3], 0  ;;  %v23_v17 = vld [vmem:[%s1143_s0 + $0x20] sm:$0xff]  ;;  %v24_v18 = vld [vmem:[%s1143_s0 + $0x28] sm:$0xff]  ;;  %vm374_vm3 = vcmask 523264   ;;  %vm615_vm4 = vcmask 1041409  }
   0xb   :  { %v39_v19 = vld [vmem:[%s1143_s0 + $0xa0] sm:$0xff]  ;;  %v40_v20 = vld [vmem:[%s1143_s0 + $0xa8] sm:$0xff]  ;;  %v51_v21 = vpack.c.bf16 %v24_v18, %v23_v17  ;;  %v25_v23 = vld [vmem:[%s1143_s0 + $0x30] sm:$0xff]  ;;  %vm617_vm5 = vcmask 1042434   ;;  %vm619_vm6 = vcmask 1043459   ;;  %vm621_vm7 = vcmask 1044484  }
   0xc   :  { %v59_v22 = vpack.c.bf16 %v40_v20, %v39_v19  ;;  %v26_v24 = vld [vmem:[%s1143_s0 + $0x38] sm:$0xff]  ;;  %v41_v25 = vld [vmem:[%s1143_s0 + $0xb0] sm:$0xff]  ;;  %v27_v29 = vld [vmem:[%s1143_s0 + $0x40] sm:$0xff]  ;;  %vm623_vm8 = vcmask 1045509   ;;  %vm625_vm9 = vcmask 1046534   ;;  %vm627_vm10 = vcmask 1047559  }
   0xd   :  { %v42_v26 = vld [vmem:[%s1143_s0 + $0xb8] sm:$0xff]  ;;  %v52_v27 = vpack.c.bf16 %v26_v24, %v25_v23  ;;  %v28_v30 = vld [vmem:[%s1143_s0 + $0x48] sm:$0xff]  ;;  %v43_v31 = vld [vmem:[%s1143_s0 + $0xc0] sm:$0xff]  ;;  %vm655_vm11 = vcmask 521216  }
   0xe   :  { %v60_v28 = vpack.c.bf16 %v42_v26, %v41_v25  ;;  %v44_v32 = vld [vmem:[%s1143_s0 + $0xc8] sm:$0xff]  ;;  %v53_v33 = vpack.c.bf16 %v28_v30, %v27_v29  ;;  %v29_v35 = vld [vmem:[%s1143_s0 + $0x50] sm:$0xff]  ;;  %v30_v36 = vld [vmem:[%s1143_s0 + $0x58] sm:$0xff] }
   0xf   :  { %v61_v34 = vpack.c.bf16 %v44_v32, %v43_v31  ;;  %v45_v37 = vld [vmem:[%s1143_s0 + $0xd0] sm:$0xff]  ;;  %v46_v38 = vld [vmem:[%s1143_s0 + $0xd8] sm:$0xff]  ;;  %v54_v39 = vpack.c.bf16 %v30_v36, %v29_v35  ;;  %v31_v41 = vld [vmem:[%s1143_s0 + $0x60] sm:$0xff] }
  0x10   :  { %713 = vmatmul.mubr.msk.bf16.gmra.mrb[4].mxu0 %vm67_vm2, %v50_v15  ;;  %745 = vmatmul.mubr.msk.bf16.gmra.mrb[4].mxu1 %vm67_vm2, %v58_v16  ;;  %v62_v40 = vpack.c.bf16 %v46_v38, %v45_v37  ;;  %v32_v42 = vld [vmem:[%s1143_s0 + $0x68] sm:$0xff]  ;;  %v47_v43 = vld [vmem:[%s1143_s0 + $0xe0] sm:$0xff]  ;;  %v33_v47 = vld [vmem:[%s1143_s0 + $0x70] sm:$0xff] }
  0x11   :  { %716 = vmatprep.mubr.msk.bf16.mxu0 %vm800_vm1, %v799_v2  ;;  %748 = vmatprep.mubr.msk.bf16.mxu1 %vm800_vm1, %v799_v2  ;;  %v48_v44 = vld [vmem:[%s1143_s0 + $0xe8] sm:$0xff]  ;;  %v55_v45 = vpack.c.bf16 %v32_v42, %v31_v41  ;;  %v34_v48 = vld [vmem:[%s1143_s0 + $0x78] sm:$0xff]  ;;  %v975_v50 = vld [vmem:[%s1145_s2] ss:$0 sm:$0xff]  ;;  %s801_s0 = smov [#allocation2]  }
  0x12   :  { %v63_v46 = vpack.c.bf16 %v48_v44, %v47_v43  ;;  %v56_v49 = vpack.c.bf16 %v34_v48, %v33_v47  ;;  %v980_v52 = vld [vmem:[%s1146_s3] ss:$0 sm:$0xff]  ;;  %s662_s2 = sshll.u32 %s801_s0, 4  ;;  %s663_s2 = int_to_ptr.vmem [resolvable:$true] %s662_s2 }
  0x13   :  { %s775_s3 = scalar_lea.vmem %s663_s2, 512  ;;  %p780_p1 = scmp.lt.s32.totalorder %s663_s2, %s663_s2 }
  0x14   :  { %p776_p0 = scmp.ne.s32.totalorder %s663_s2, %s775_s3  ;;  %p781_p2 = scmp.lt.s32.totalorder %s775_s3, %s775_s3 }
  0x16   :  { %p782_p3 = por %p781_p2, %p780_p1 }
  0x18   :  { %717 = vmatmul.mubr.msk.bf16.gmra.mrb[8].mxu0 %vm67_vm2, %v51_v21  ;;  %749 = vmatmul.mubr.msk.bf16.gmra.mrb[8].mxu1 %vm67_vm2, %v59_v22  ;;  %p783_p4 = pnand %p782_p3, %p776_p0 }
  0x19   :  { %720 = vmatprep.mubr.msk.bf16.mxu0 %vm800_vm1, %v799_v2  ;;  %752 = vmatprep.mubr.msk.bf16.mxu1 %vm800_vm1, %v799_v2 }
  0x20   :  { %721 = vmatmul.mubr.msk.bf16.gmra.mrb[12].mxu0 %vm67_vm2, %v52_v27  ;;  %753 = vmatmul.mubr.msk.bf16.gmra.mrb[12].mxu1 %vm67_vm2, %v60_v28 }
  0x21   :  { %724 = vmatprep.mubr.msk.bf16.mxu0 %vm800_vm1, %v799_v2  ;;  %756 = vmatprep.mubr.msk.bf16.mxu1 %vm800_vm1, %v799_v2 }
  0x28   :  { %725 = vmatmul.mubr.msk.bf16.gmra.mrb[16].mxu0 %vm67_vm2, %v53_v33  ;;  %757 = vmatmul.mubr.msk.bf16.gmra.mrb[16].mxu1 %vm67_vm2, %v61_v34 }
  0x29   :  { %728 = vmatprep.mubr.msk.bf16.mxu0 %vm800_vm1, %v799_v2  ;;  %760 = vmatprep.mubr.msk.bf16.mxu1 %vm800_vm1, %v799_v2 }
  0x30   :  { %729 = vmatmul.mubr.msk.bf16.gmra.mrb[20].mxu0 %vm67_vm2, %v54_v39  ;;  %761 = vmatmul.mubr.msk.bf16.gmra.mrb[20].mxu1 %vm67_vm2, %v62_v40 }
  0x31   :  { %732 = vmatprep.mubr.msk.bf16.mxu0 %vm800_vm1, %v799_v2  ;;  %764 = vmatprep.mubr.msk.bf16.mxu1 %vm800_vm1, %v799_v2 }
  0x38   :  { %733 = vmatmul.mubr.msk.bf16.gmra.mrb[24].mxu0 %vm67_vm2, %v55_v45  ;;  %765 = vmatmul.mubr.msk.bf16.gmra.mrb[24].mxu1 %vm67_vm2, %v63_v46 }
  0x39   :  { %736 = vmatprep.mubr.msk.bf16.mxu0 %vm800_vm1, %v799_v2 }
  0x40   :  { %737 = vmatmul.mubr.msk.bf16.gmra.mrb[28].mxu0 %vm67_vm2, %v56_v49 }
  0xdb   :  { %v151_v51 = vpop.f32.mrb[0].mxu0  ;;  %v215_v53 = vpop.f32.mrb[0].mxu1 }
  0xdc   :  { %v277_v54 = vmul.f32 %v975_v50, %v151_v51  ;;  %v293_v55 = vmul.f32 %v975_v50, %v215_v53  ;;  %v710_v56 = vpop.f32.mrb[1].mxu0  ;;  %v742_v57 = vpop.f32.mrb[1].mxu1 }
  0xdd   :  { %v154_v58 = vpop.f32.mrb[2].mxu0  ;;  %v218_v59 = vpop.f32.mrb[2].mxu1 }
  0xde   :  { %v314_v60 = vadd.f32 %v980_v52, %v277_v54  ;;  %v330_v61 = vadd.f32 %v980_v52, %v293_v55  ;;  %v278_v62 = vmul.f32 %v975_v50, %v154_v58  ;;  %v294_v63 = vmul.f32 %v975_v50, %v218_v59  ;;  %v711_v0 = vpop.f32.mrb[3].mxu0  ;;  %v743_v1 = vpop.f32.mrb[3].mxu1 }
  0xe0   :  { %v344_v2 = vmax.f32 %v314_v60, 0.0  ;;  %v360_v3 = vmax.f32 %v330_v61, 0.0  ;;  %v315_v4 = vadd.f32 %v980_v52, %v278_v62  ;;  %v331_v5 = vadd.f32 %v980_v52, %v294_v63 }
  0xe2   :  { %v375_v6 = vsel %vm374_vm3, %v344_v2, -inf  ;;  %v487_v7 = vsel %vm374_vm3, %v360_v3, -inf  ;;  %v345_v8 = vmax.f32 %v315_v4, 0.0  ;;  %v361_v9 = vmax.f32 %v331_v5, 0.0 }
  0xe3   :  { %v376_v10 = vrot.slane %v375_v6, 4  ;;  %v488_v11 = vrot.slane %v487_v7, 4  ;;  %v159_v12 = vpop.f32.mrb[4].mxu0  ;;  %v223_v13 = vpop.f32.mrb[4].mxu1 }
  0xe4   :  { %v382_v14 = vsel %vm374_vm3, %v345_v8, -inf  ;;  %v494_v15 = vsel %vm374_vm3, %v361_v9, -inf  ;;  %v279_v16 = vmul.f32 %v975_v50, %v159_v12  ;;  %v295_v17 = vmul.f32 %v975_v50, %v223_v13  ;;  %v714_v18 = vpop.f32.mrb[5].mxu0  ;;  %v746_v19 = vpop.f32.mrb[5].mxu1 }
  0xe5   :  { %v377_v20 = vmax.f32 %v375_v6, %v376_v10  ;;  %v489_v21 = vmax.f32 %v487_v7, %v488_v11  ;;  %v383_v22 = vrot.slane %v382_v14, 4  ;;  %v495_v23 = vrot.slane %v494_v15, 4  ;;  %v162_v24 = vpop.f32.mrb[6].mxu0  ;;  %v226_v25 = vpop.f32.mrb[6].mxu1 }
  0xe6   :  { %v316_v26 = vadd.f32 %v980_v52, %v279_v16  ;;  %v332_v27 = vadd.f32 %v980_v52, %v295_v17  ;;  %v280_v28 = vmul.f32 %v975_v50, %v162_v24  ;;  %v296_v29 = vmul.f32 %v975_v50, %v226_v25  ;;  %v715_v30 = vpop.f32.mrb[7].mxu0  ;;  %v747_v31 = vpop.f32.mrb[7].mxu1 }
  0xe7   :  { %v378_v32 = vrot.slane %v377_v20, 2  ;;  %v490_v33 = vrot.slane %v489_v21, 2  ;;  %v384_v34 = vmax.f32 %v382_v14, %v383_v22  ;;  %v496_v35 = vmax.f32 %v494_v15, %v495_v23 }
  0xe8   :  { %v346_v36 = vmax.f32 %v316_v26, 0.0  ;;  %v362_v37 = vmax.f32 %v332_v27, 0.0  ;;  %v317_v38 = vadd.f32 %v980_v52, %v280_v28  ;;  %v333_v39 = vadd.f32 %v980_v52, %v296_v29 }
  0xe9   :  { %v379_v40 = vmax.f32 %v377_v20, %v378_v32  ;;  %v491_v41 = vmax.f32 %v489_v21, %v490_v33  ;;  %v385_v42 = vrot.slane %v384_v34, 2  ;;  %v497_v43 = vrot.slane %v496_v35, 2 }
  0xea   :  { %v389_v44 = vsel %vm374_vm3, %v346_v36, -inf  ;;  %v501_v45 = vsel %vm374_vm3, %v362_v37, -inf  ;;  %v347_v46 = vmax.f32 %v317_v38, 0.0  ;;  %v363_v47 = vmax.f32 %v333_v39, 0.0 }
  0xeb   :  { %v380_v48 = vrot.slane %v379_v40, 1  ;;  %v492_v49 = vrot.slane %v491_v41, 1  ;;  %v386_v51 = vmax.f32 %v384_v34, %v385_v42  ;;  %v498_v53 = vmax.f32 %v496_v35, %v497_v43  ;;  %v167_v54 = vpop.f32.mrb[8].mxu0  ;;  %v231_v55 = vpop.f32.mrb[8].mxu1 }
  0xec   :  { %v390_v56 = vrot.slane %v389_v44, 4  ;;  %v502_v57 = vrot.slane %v501_v45, 4  ;;  %v396_v58 = vsel %vm374_vm3, %v347_v46, -inf  ;;  %v508_v59 = vsel %vm374_vm3, %v363_v47, -inf  ;;  %v718_v60 = vpop.f32.mrb[9].mxu0  ;;  %v750_v61 = vpop.f32.mrb[9].mxu1 }
  0xed   :  { %v381_v62 = vmax.f32 %v379_v40, %v380_v48  ;;  %v493_v63 = vmax.f32 %v491_v41, %v492_v49  ;;  %v387_v0 = vrot.slane %v386_v51, 1  ;;  %v499_v1 = vrot.slane %v498_v53, 1  ;;  %v170_v2 = vpop.f32.mrb[10].mxu0  ;;  %v234_v3 = vpop.f32.mrb[10].mxu1 }
  0xee   :  { %v391_v4 = vmax.f32 %v389_v44, %v390_v56  ;;  %v503_v5 = vmax.f32 %v501_v45, %v502_v57  ;;  %v397_v6 = vrot.slane %v396_v58, 4  ;;  %v509_v7 = vrot.slane %v508_v59, 4  ;;  %v719_v8 = vpop.f32.mrb[11].mxu0  ;;  %v751_v9 = vpop.f32.mrb[11].mxu1 }
  0xef   :  { %v388_v10 = vmax.f32 %v386_v51, %v387_v0  ;;  %v500_v11 = vmax.f32 %v498_v53, %v499_v1  ;;  %v281_v12 = vmul.f32 %v975_v50, %v167_v54  ;;  %v297_v13 = vmul.f32 %v975_v50, %v231_v55 }
  0xf0   :  { %v392_v14 = vrot.slane %v391_v4, 2  ;;  %v504_v15 = vrot.slane %v503_v5, 2  ;;  %v398_v16 = vmax.f32 %v396_v58, %v397_v6  ;;  %v510_v17 = vmax.f32 %v508_v59, %v509_v7 }
  0xf1   :  { %v616_v18 = vsel %vm615_vm4, %v388_v10, %v381_v62  ;;  %v636_v19 = vsel %vm615_vm4, %v500_v11, %v493_v63  ;;  %v318_v20 = vadd.f32 %v980_v52, %v281_v12  ;;  %v334_v21 = vadd.f32 %v980_v52, %v297_v13 }
  0xf2   :  { %v393_v22 = vmax.f32 %v391_v4, %v392_v14  ;;  %v505_v23 = vmax.f32 %v503_v5, %v504_v15  ;;  %v399_v24 = vrot.slane %v398_v16, 2  ;;  %v511_v25 = vrot.slane %v510_v17, 2 }
  0xf3   :  { %v348_v26 = vmax.f32 %v318_v20, 0.0  ;;  %v364_v27 = vmax.f32 %v334_v21, 0.0  ;;  %v282_v28 = vmul.f32 %v975_v50, %v170_v2  ;;  %v298_v29 = vmul.f32 %v975_v50, %v234_v3  ;;  %v175_v30 = vpop.f32.mrb[12].mxu0  ;;  %v239_v31 = vpop.f32.mrb[12].mxu1 }
  0xf4   :  { %v394_v32 = vrot.slane %v393_v22, 1  ;;  %v506_v33 = vrot.slane %v505_v23, 1  ;;  %v400_v34 = vmax.f32 %v398_v16, %v399_v24  ;;  %v512_v35 = vmax.f32 %v510_v17, %v511_v25  ;;  %v722_v36 = vpop.f32.mrb[13].mxu0  ;;  %v754_v37 = vpop.f32.mrb[13].mxu1 }
  0xf5   :  { %v403_v38 = vsel %vm374_vm3, %v348_v26, -inf  ;;  %v515_v39 = vsel %vm374_vm3, %v364_v27, -inf  ;;  %v319_v40 = vadd.f32 %v980_v52, %v282_v28  ;;  %v335_v41 = vadd.f32 %v980_v52, %v298_v29  ;;  %v178_v42 = vpop.f32.mrb[14].mxu0  ;;  %v242_v43 = vpop.f32.mrb[14].mxu1 }
  0xf6   :  { %v395_v44 = vmax.f32 %v393_v22, %v394_v32  ;;  %v507_v45 = vmax.f32 %v505_v23, %v506_v33  ;;  %v401_v46 = vrot.slane %v400_v34, 1  ;;  %v513_v47 = vrot.slane %v512_v35, 1  ;;  %v723_v48 = vpop.f32.mrb[15].mxu0  ;;  %v755_v49 = vpop.f32.mrb[15].mxu1 }
  0xf7   :  { %v404_v51 = vrot.slane %v403_v38, 4  ;;  %v516_v53 = vrot.slane %v515_v39, 4  ;;  %v349_v54 = vmax.f32 %v319_v40, 0.0  ;;  %v365_v55 = vmax.f32 %v335_v41, 0.0 }
  0xf8   :  { %v618_v56 = vsel %vm617_vm5, %v395_v44, %v616_v18  ;;  %v637_v57 = vsel %vm617_vm5, %v507_v45, %v636_v19  ;;  %v402_v58 = vmax.f32 %v400_v34, %v401_v46  ;;  %v514_v59 = vmax.f32 %v512_v35, %v513_v47 }
  0xf9   :  { %v405_v60 = vmax.f32 %v403_v38, %v404_v51  ;;  %v517_v61 = vmax.f32 %v515_v39, %v516_v53  ;;  %v410_v62 = vsel %vm374_vm3, %v349_v54, -inf  ;;  %v522_v63 = vsel %vm374_vm3, %v365_v55, -inf }
  0xfa   :  { %v620_v0 = vsel %vm619_vm6, %v402_v58, %v618_v56  ;;  %v638_v1 = vsel %vm619_vm6, %v514_v59, %v637_v57  ;;  %v411_v2 = vrot.slane %v410_v62, 4  ;;  %v523_v3 = vrot.slane %v522_v63, 4 }
  0xfb   :  { %v406_v4 = vrot.slane %v405_v60, 2  ;;  %v518_v5 = vrot.slane %v517_v61, 2  ;;  %v283_v6 = vmul.f32 %v975_v50, %v175_v30  ;;  %v299_v7 = vmul.f32 %v975_v50, %v239_v31  ;;  %v183_v8 = vpop.f32.mrb[16].mxu0  ;;  %v247_v9 = vpop.f32.mrb[16].mxu1 }
  0xfc   :  { %v412_v10 = vmax.f32 %v410_v62, %v411_v2  ;;  %v524_v11 = vmax.f32 %v522_v63, %v523_v3  ;;  %v284_v12 = vmul.f32 %v975_v50, %v178_v42  ;;  %v300_v13 = vmul.f32 %v975_v50, %v242_v43  ;;  %v726_v14 = vpop.f32.mrb[17].mxu0  ;;  %v758_v15 = vpop.f32.mrb[17].mxu1 }
  0xfd   :  { %v407_v16 = vmax.f32 %v405_v60, %v406_v4  ;;  %v519_v17 = vmax.f32 %v517_v61, %v518_v5  ;;  %v320_v18 = vadd.f32 %v980_v52, %v283_v6  ;;  %v336_v19 = vadd.f32 %v980_v52, %v299_v7  ;;  %v186_v20 = vpop.f32.mrb[18].mxu0  ;;  %v250_v21 = vpop.f32.mrb[18].mxu1 }
  0xfe   :  { %v413_v22 = vrot.slane %v412_v10, 2  ;;  %v525_v23 = vrot.slane %v524_v11, 2  ;;  %v321_v24 = vadd.f32 %v980_v52, %v284_v12  ;;  %v337_v25 = vadd.f32 %v980_v52, %v300_v13  ;;  %v727_v26 = vpop.f32.mrb[19].mxu0  ;;  %v759_v27 = vpop.f32.mrb[19].mxu1 }
  0xff   :  { %v408_v28 = vrot.slane %v407_v16, 1  ;;  %v520_v29 = vrot.slane %v519_v17, 1  ;;  %v350_v30 = vmax.f32 %v320_v18, 0.0  ;;  %v366_v31 = vmax.f32 %v336_v19, 0.0 }
 0x100   :  { %v414_v32 = vmax.f32 %v412_v10, %v413_v22  ;;  %v526_v33 = vmax.f32 %v524_v11, %v525_v23  ;;  %v351_v34 = vmax.f32 %v321_v24, 0.0  ;;  %v367_v35 = vmax.f32 %v337_v25, 0.0 }
 0x101   :  { %v409_v36 = vmax.f32 %v407_v16, %v408_v28  ;;  %v521_v37 = vmax.f32 %v519_v17, %v520_v29  ;;  %v417_v38 = vsel %vm374_vm3, %v350_v30, -inf  ;;  %v529_v39 = vsel %vm374_vm3, %v366_v31, -inf }
 0x102   :  { %v415_v40 = vrot.slane %v414_v32, 1  ;;  %v527_v41 = vrot.slane %v526_v33, 1  ;;  %v418_v42 = vrot.slane %v417_v38, 4  ;;  %v530_v43 = vrot.slane %v529_v39, 4 }
 0x103   :  { %v622_v44 = vsel %vm621_vm7, %v409_v36, %v620_v0  ;;  %v639_v45 = vsel %vm621_vm7, %v521_v37, %v638_v1  ;;  %v424_v46 = vsel %vm374_vm3, %v351_v34, -inf  ;;  %v536_v47 = vsel %vm374_vm3, %v367_v35, -inf  ;;  %v1038_v48 = vpop.f32.mrb[20].mxu0  ;;  %v1040_v49 = vpop.f32.mrb[20].mxu1 }
 0x104   :  { %v416_v51 = vmax.f32 %v414_v32, %v415_v40  ;;  %v528_v53 = vmax.f32 %v526_v33, %v527_v41  ;;  %v419_v54 = vmax.f32 %v417_v38, %v418_v42  ;;  %v531_v55 = vmax.f32 %v529_v39, %v530_v43  ;;  %v730_v56 = vpop.f32.mrb[21].mxu0  ;;  %v762_v57 = vpop.f32.mrb[21].mxu1 }
 0x105   :  { %v425_v58 = vrot.slane %v424_v46, 4  ;;  %v537_v59 = vrot.slane %v536_v47, 4  ;;  %v285_v60 = vmul.f32 %v975_v50, %v183_v8  ;;  %v301_v61 = vmul.f32 %v975_v50, %v247_v9  ;;  %v1044_v62 = vpop.f32.mrb[22].mxu0  ;;  %v1046_v63 = vpop.f32.mrb[22].mxu1 }
 0x106   :  { %v624_v0 = vsel %vm623_vm8, %v416_v51, %v622_v44  ;;  %v640_v1 = vsel %vm623_vm8, %v528_v53, %v639_v45  ;;  %v420_v2 = vrot.slane %v419_v54, 2  ;;  %v532_v3 = vrot.slane %v531_v55, 2  ;;  %v731_v4 = vpop.f32.mrb[23].mxu0  ;;  %v763_v5 = vpop.f32.mrb[23].mxu1 }
 0x107   :  { %v426_v6 = vmax.f32 %v424_v46, %v425_v58  ;;  %v538_v7 = vmax.f32 %v536_v47, %v537_v59  ;;  %v322_v10 = vadd.f32 %v980_v52, %v285_v60  ;;  %v338_v8 = vadd.f32 %v980_v52, %v301_v61 }
 0x108   :  { %v421_v9 = vmax.f32 %v419_v54, %v420_v2  ;;  %v533_v11 = vmax.f32 %v531_v55, %v532_v3  ;;  %v286_v12 = vmul.f32 %v975_v50, %v186_v20  ;;  %v302_v13 = vmul.f32 %v975_v50, %v250_v21 }
 0x109   :  { %v427_v14 = vrot.slane %v426_v6, 2  ;;  %v539_v15 = vrot.slane %v538_v7, 2  ;;  %v352_v16 = vmax.f32 %v322_v10, 0.0  ;;  %v368_v17 = vmax.f32 %v338_v8, 0.0 }
 0x10a   :  { %v422_v18 = vrot.slane %v421_v9, 1  ;;  %v534_v19 = vrot.slane %v533_v11, 1  ;;  %v323_v22 = vadd.f32 %v980_v52, %v286_v12  ;;  %v339_v23 = vadd.f32 %v980_v52, %v302_v13 }
 0x10b   :  { %v428_v24 = vmax.f32 %v426_v6, %v427_v14  ;;  %v540_v25 = vmax.f32 %v538_v7, %v539_v15  ;;  %v431_v26 = vsel %vm374_vm3, %v352_v16, -inf  ;;  %v543_v27 = vsel %vm374_vm3, %v368_v17, -inf  ;;  %v1058_v28 = vpop.f32.mrb[24].mxu0  ;;  %v1060_v20 = vpop.f32.mrb[24].mxu1 }
 0x10c   :  { %v423_v21 = vmax.f32 %v421_v9, %v422_v18  ;;  %v535_v29 = vmax.f32 %v533_v11, %v534_v19  ;;  %v432_v30 = vrot.slane %v431_v26, 4  ;;  %v544_v31 = vrot.slane %v543_v27, 4  ;;  %v734_v32 = vpop.f32.mrb[25].mxu0  ;;  %v766_v33 = vpop.f32.mrb[25].mxu1 }
 0x10d   :  { %v429_v34 = vrot.slane %v428_v24, 1  ;;  %v541_v35 = vrot.slane %v540_v25, 1  ;;  %v353_v36 = vmax.f32 %v323_v22, 0.0  ;;  %v369_v37 = vmax.f32 %v339_v23, 0.0  ;;  %v1062_v38 = vpop.f32.mrb[26].mxu0  ;;  %v1064_v39 = vpop.f32.mrb[26].mxu1 }
 0x10e   :  { %v626_v40 = vsel %vm625_vm9, %v423_v21, %v624_v0  ;;  %v641_v41 = vsel %vm625_vm9, %v535_v29, %v640_v1  ;;  %v433_v42 = vmax.f32 %v431_v26, %v432_v30  ;;  %v545_v43 = vmax.f32 %v543_v27, %v544_v31  ;;  %v735_v44 = vpop.f32.mrb[27].mxu0  ;;  %v767_v45 = vpop.f32.mrb[27].mxu1 }
 0x10f   :  { %v430_v46 = vmax.f32 %v428_v24, %v429_v34  ;;  %v542_v47 = vmax.f32 %v540_v25, %v541_v35  ;;  %v438_v51 = vsel %vm374_vm3, %v353_v36, -inf  ;;  %v550_v53 = vsel %vm374_vm3, %v369_v37, -inf }
 0x110   :  { %v434_v54 = vrot.slane %v433_v42, 2  ;;  %v546_v55 = vrot.slane %v545_v43, 2  ;;  %v439_v56 = vrot.slane %v438_v51, 4  ;;  %v551_v57 = vrot.slane %v550_v53, 4 }
 0x111   :  { %v628_v58 = vsel %vm627_vm10, %v430_v46, %v626_v40  ;;  %v642_v59 = vsel %vm627_vm10, %v542_v47, %v641_v41  ;;  %v287_v60 = vmul.f32 %v975_v50, %v1038_v48  ;;  %v303_v61 = vmul.f32 %v975_v50, %v1040_v49 }
 0x112   :  { %652 = vst.msk [vmem:[#allocation2] sm:$0xff] %vm374_vm3, %v628_v58  ;;  %654 = vst.msk [vmem:[#allocation2 + $0x10] sm:$0xff] %vm374_vm3, %v642_v59  ;;  %v435_v0 = vmax.f32 %v433_v42, %v434_v54  ;;  %v547_v1 = vmax.f32 %v545_v43, %v546_v55  ;;  %v440_v2 = vmax.f32 %v438_v51, %v439_v56 }
 0x113   :  { %v552_v3 = vmax.f32 %v550_v53, %v551_v57  ;;  %v324_v4 = vadd.f32 %v980_v52, %v287_v60  ;;  %v340_v5 = vadd.f32 %v980_v52, %v303_v61  ;;  %v288_v6 = vmul.f32 %v975_v50, %v1044_v62  ;;  %v1084_v7 = vpop.f32.mrb[28].mxu0 }
 0x114   :  { %v304_v48 = vmul.f32 %v975_v50, %v1046_v63  ;;  %v436_v49 = vrot.slane %v435_v0, 1  ;;  %v548_v10 = vrot.slane %v547_v1, 1  ;;  %v441_v8 = vrot.slane %v440_v2, 2  ;;  %v738_v11 = vpop.f32.mrb[29].mxu0 }
 0x115   :  { %v553_v9 = vrot.slane %v552_v3, 2  ;;  %v354_v12 = vmax.f32 %v324_v4, 0.0  ;;  %v370_v13 = vmax.f32 %v340_v5, 0.0  ;;  %v325_v14 = vadd.f32 %v980_v52, %v288_v6  ;;  %v1088_v16 = vpop.f32.mrb[30].mxu0 }
 0x116   :  { %v341_v15 = vadd.f32 %v980_v52, %v304_v48  ;;  %v437_v17 = vmax.f32 %v435_v0, %v436_v49  ;;  %v549_v62 = vmax.f32 %v547_v1, %v548_v10  ;;  %v442_v18 = vmax.f32 %v440_v2, %v441_v8  ;;  %v739_v63 = vpop.f32.mrb[31].mxu0 }
 0x117   :  { %v554_v19 = vmax.f32 %v552_v3, %v553_v9  ;;  %v445_v22 = vsel %vm374_vm3, %v354_v12, -inf  ;;  %v557_v23 = vsel %vm374_vm3, %v370_v13, -inf  ;;  %v355_v24 = vmax.f32 %v325_v14, 0.0 }
 0x118   :  { %v371_v25 = vmax.f32 %v341_v15, 0.0  ;;  %v443_v26 = vrot.slane %v442_v18, 1  ;;  %v446_v21 = vrot.slane %v445_v22, 4  ;;  %v558_v29 = vrot.slane %v557_v23, 4 }
 0x119   :  { %v555_v27 = vrot.slane %v554_v19, 1  ;;  %v452_v30 = vsel %vm374_vm3, %v355_v24, -inf  ;;  %v289_v32 = vmul.f32 %v975_v50, %v1058_v28  ;;  %v305_v33 = vmul.f32 %v975_v50, %v1060_v20 }
 0x11a   :  { %v564_v31 = vsel %vm374_vm3, %v371_v25, -inf  ;;  %v444_v34 = vmax.f32 %v442_v18, %v443_v26  ;;  %v447_v36 = vmax.f32 %v445_v22, %v446_v21  ;;  %v559_v37 = vmax.f32 %v557_v23, %v558_v29 }
 0x11b   :  { %v556_v35 = vmax.f32 %v554_v19, %v555_v27  ;;  %v453_v40 = vrot.slane %v452_v30, 4  ;;  %v565_v41 = vrot.slane %v564_v31, 4  ;;  %v326_v42 = vadd.f32 %v980_v52, %v289_v32 }
 0x11c   :  { %v342_v43 = vadd.f32 %v980_v52, %v305_v33  ;;  %v629_v44 = vsel %vm615_vm4, %v444_v34, %v437_v17  ;;  %v448_v46 = vrot.slane %v447_v36, 2  ;;  %v560_v47 = vrot.slane %v559_v37, 2 }
 0x11d   :  { %v643_v45 = vsel %vm615_vm4, %v556_v35, %v549_v62  ;;  %v454_v28 = vmax.f32 %v452_v30, %v453_v40  ;;  %v566_v51 = vmax.f32 %v564_v31, %v565_v41  ;;  %v356_v53 = vmax.f32 %v326_v42, 0.0 }
 0x11e   :  { %v372_v20 = vmax.f32 %v342_v43, 0.0  ;;  %v449_v54 = vmax.f32 %v447_v36, %v448_v46  ;;  %v561_v55 = vmax.f32 %v559_v37, %v560_v47  ;;  %v290_v56 = vmul.f32 %v975_v50, %v1062_v38 }
 0x11f   :  { %v306_v57 = vmul.f32 %v975_v50, %v1064_v39  ;;  %v455_v58 = vrot.slane %v454_v28, 2  ;;  %v567_v59 = vrot.slane %v566_v51, 2  ;;  %v459_v60 = vsel %vm374_vm3, %v356_v53, -inf }
 0x120   :  { %v571_v61 = vsel %vm374_vm3, %v372_v20, -inf  ;;  %v450_v0 = vrot.slane %v449_v54, 1  ;;  %v562_v1 = vrot.slane %v561_v55, 1  ;;  %v460_v2 = vrot.slane %v459_v60, 4 }
 0x121   :  { %v572_v3 = vrot.slane %v571_v61, 4  ;;  %v456_v4 = vmax.f32 %v454_v28, %v455_v58  ;;  %v568_v5 = vmax.f32 %v566_v51, %v567_v59  ;;  %v327_v6 = vadd.f32 %v980_v52, %v290_v56 }
 0x122   :  { %v343_v48 = vadd.f32 %v980_v52, %v306_v57  ;;  %v451_v38 = vmax.f32 %v449_v54, %v450_v0  ;;  %v563_v49 = vmax.f32 %v561_v55, %v562_v1  ;;  %v461_v10 = vmax.f32 %v459_v60, %v460_v2 }
 0x123   :  { %v573_v39 = vmax.f32 %v571_v61, %v572_v3  ;;  %v457_v8 = vrot.slane %v456_v4, 1  ;;  %v569_v9 = vrot.slane %v568_v5, 1  ;;  %v357_v11 = vmax.f32 %v327_v6, 0.0 }
 0x124   :  { %v373_v12 = vmax.f32 %v343_v48, 0.0  ;;  %v630_v13 = vsel %vm617_vm5, %v451_v38, %v629_v44  ;;  %v644_v14 = vsel %vm617_vm5, %v563_v49, %v643_v45  ;;  %v462_v15 = vrot.slane %v461_v10, 2 }
 0x125   :  { %v574_v17 = vrot.slane %v573_v39, 2  ;;  %v458_v62 = vmax.f32 %v456_v4, %v457_v8  ;;  %v570_v18 = vmax.f32 %v568_v5, %v569_v9  ;;  %v466_v19 = vsel %vm374_vm3, %v357_v11, -inf }
 0x126   :  { %v578_v63 = vsel %vm374_vm3, %v373_v12, -inf  ;;  %v463_v22 = vmax.f32 %v461_v10, %v462_v15  ;;  %v467_v24 = vrot.slane %v466_v19, 4  ;;  %v291_v21 = vmul.f32 %v975_v50, %v1084_v7 }
 0x127   :  { %v575_v23 = vmax.f32 %v573_v39, %v574_v17  ;;  %v579_v25 = vrot.slane %v578_v63, 4  ;;  %v631_v26 = vsel %vm619_vm6, %v458_v62, %v630_v13  ;;  %v645_v27 = vsel %vm619_vm6, %v570_v18, %v644_v14 }
 0x128   :  { %v292_v29 = vmul.f32 %v975_v50, %v1088_v16  ;;  %v464_v30 = vrot.slane %v463_v22, 1  ;;  %v468_v32 = vmax.f32 %v466_v19, %v467_v24  ;;  %v328_v34 = vadd.f32 %v980_v52, %v291_v21 }
 0x129   :  { %v576_v31 = vrot.slane %v575_v23, 1  ;;  %v580_v33 = vmax.f32 %v578_v63, %v579_v25 }
 0x12a   :  { %v329_v35 = vadd.f32 %v980_v52, %v292_v29  ;;  %v465_v36 = vmax.f32 %v463_v22, %v464_v30  ;;  %v469_v40 = vrot.slane %v468_v32, 2  ;;  %v358_v42 = vmax.f32 %v328_v34, 0.0 }
 0x12b   :  { %v577_v37 = vmax.f32 %v575_v23, %v576_v31  ;;  %v581_v41 = vrot.slane %v580_v33, 2 }
 0x12c   :  { %v359_v43 = vmax.f32 %v329_v35, 0.0  ;;  %v632_v44 = vsel %vm621_vm7, %v465_v36, %v631_v26  ;;  %v470_v45 = vmax.f32 %v468_v32, %v469_v40  ;;  %v473_v16 = vsel %vm374_vm3, %v358_v42, -inf }
 0x12d   :  { %v646_v7 = vsel %vm621_vm7, %v577_v37, %v645_v27  ;;  %v582_v50 = vmax.f32 %v580_v33, %v581_v41  ;;  %v474_v51 = vrot.slane %v473_v16, 4 }
 0x12e   :  { %v480_v46 = vsel %vm374_vm3, %v359_v43, -inf  ;;  %v471_v47 = vrot.slane %v470_v45, 1 }
 0x12f   :  { %v583_v28 = vrot.slane %v582_v50, 1  ;;  %v481_v52 = vrot.slane %v480_v46, 4  ;;  %v475_v54 = vmax.f32 %v473_v16, %v474_v51 }
 0x130   :  { %v472_v53 = vmax.f32 %v470_v45, %v471_v47 }
 0x131   :  { %v584_v20 = vmax.f32 %v582_v50, %v583_v28  ;;  %v482_v55 = vmax.f32 %v480_v46, %v481_v52  ;;  %v476_v58 = vrot.slane %v475_v54, 2 }
 0x132   :  { %v633_v56 = vsel %vm623_vm8, %v472_v53, %v632_v44 }
 0x133   :  { %v647_v57 = vsel %vm623_vm8, %v584_v20, %v646_v7  ;;  %v483_v59 = vrot.slane %v482_v55, 2  ;;  %v477_v60 = vmax.f32 %v475_v54, %v476_v58 }
 0x134   :  { %656 = vst.msk [vmem:[#allocation2 + $0x18] sm:$0x3f] %vm655_vm11, %v647_v57 }
 0x135   :  { %v484_v61 = vmax.f32 %v482_v55, %v483_v59  ;;  %v478_v0 = vrot.slane %v477_v60, 1 }
 0x137   :  { %v485_v1 = vrot.slane %v484_v61, 1  ;;  %v479_v2 = vmax.f32 %v477_v60, %v478_v0 }
 0x139   :  { %v486_v3 = vmax.f32 %v484_v61, %v485_v1  ;;  %v634_v4 = vsel %vm625_vm9, %v479_v2, %v633_v56 }
 0x13b   :  { %v635_v5 = vsel %vm627_vm10, %v486_v3, %v634_v4 }
 0x13c   :  { %653 = vst.msk [vmem:[#allocation2 + $0x8] sm:$0xff] %vm374_vm3, %v635_v5 }
 0x13d   :  { %786 = shalt.err (!%p783_p4)
}
 0x13e   :  { %s787_s30 = scalar_lea.hbm %s1147_s4, 512 }
 0x13f   :  { %p788_p5 = scmp.ne.s32.totalorder %s1147_s4, %s787_s30  ;;  %p791_p6 = scmp.lt.u32.totalorder %s787_s30, %s1147_s4 }
 0x141   :  { %p793_p7 = pnand %p791_p6, %p788_p5 }
 0x143   :  { %796 = shalt.err (!%p793_p7)
}
 0x144   :  { %s802_s9 = smov 128   ;;  %s803_s10 = smov 8  }
 0x145   :  { %668 = dma.vmem_to_hbm [thread:$0]  %s663_s2, 512, %s1147_s4, [#allocation3], %s802_s9, %s802_s9, %s803_s10  }
 0x146   :  { %797 = dma.done.wait [#allocation3], 512  }
 0x147   :  { %798 = vsyncadd [#allocation3], 4294966784 }
 0x148   :  { %672 = vsyncpa [#allocation3], 1 }

</bundles_post_ra>
